<compile_context>
chip_gen: v6e
topology: v6e:2x2x1
jax: 0.10.0
libtpu: 0.0.40
codegen_flags: <defaults>
</compile_context>

<pallas_src>
import functools

import jax
import jax.numpy as jnp
from jax.experimental import pallas as pl
from jax.experimental.pallas import tpu as pltpu


def _cdiv(a, b):
    return (a + b - 1) // b


def _round_up(x, m):
    return _cdiv(x, m) * m


def _contrastive_kernel(o1_ref, o2_ref, t_ref, out_ref, dist_acc, *,
                        margin, eps, batch, block_b, feat, block_d,
                        mask_rows, mask_cols):
    i = pl.program_id(0)          # batch-tile index   ("parallel")
    d = pl.program_id(1)          # feature-tile index ("arbitrary", reduction)

    @pl.when(d == 0)
    def _init():
        dist_acc[...] = jnp.zeros_like(dist_acc)

    # Hot path: elementwise squared difference + per-row lane reduction.
    diff = o2_ref[...].astype(jnp.float32) - o1_ref[...].astype(jnp.float32)
    sq = diff * diff
    if mask_cols:  # padded tail columns of a partial last feature tile
        col_ids = d * block_d + jax.lax.broadcasted_iota(jnp.int32, sq.shape, 1)
        sq = jnp.where(col_ids < feat, sq, 0.0)
    dist_acc[...] += jnp.sum(sq, axis=-1, keepdims=True)          # (block_b, 1)

    @pl.when(d == pl.num_programs(1) - 1)
    def _finalize():
        distances = dist_acc[...]                                  # (block_b, 1)
        t = t_ref[...].astype(jnp.float32)                         # (block_b, 1)
        hinge = jnp.maximum(margin - jnp.sqrt(distances + eps), 0.0)
        losses = t * distances + (1.0 - t) * hinge * hinge
        if mask_rows:  # padded tail rows of a partial last batch tile
            row_ids = i * block_b + jax.lax.broadcasted_iota(
                jnp.int32, losses.shape, 0)
            losses = jnp.where(row_ids < batch, losses, 0.0)
        total = jnp.sum(losses)
        # Lane-dense (1, 1, 128) partial-sum slab for this batch tile.
        out_ref[...] = jnp.broadcast_to(total, out_ref.shape).astype(jnp.float32)


def _vmem_budgets():
    """(live pipeline-tile budget, scoped vmem limit) per TPU generation."""
    try:
        cap = int(pltpu.get_tpu_info().vmem_capacity_bytes)
    except Exception:
        cap = 64 * 1024 * 1024                    # conservative: v7x per-core size
    if cap >= 96 * 1024 * 1024:                   # v5e / v6e: 128 MiB physical
        return 48 * 1024 * 1024, 96 * 1024 * 1024
    # v7x: 64 MiB per TensorCore; keep headroom so both cores can double-buffer.
    return 16 * 1024 * 1024, 48 * 1024 * 1024


def _choose_tiles(B, D, itemsize, budget):
    """Pick (block_b, block_d) so 2 inputs x 2 pipeline buffers fit `budget`."""
    per_elem = 4 * itemsize                       # 2 inputs x 2 pipeline buffers
    min_tb = B if B < 8 else 8                    # sublane-aligned minimal batch tile
    if per_elem * min_tb * D <= budget:
        # Full feature dim per tile; tile (only) the batch axis.
        tb = budget // (per_elem * D)
        if tb >= B:
            return B, D                           # whole problem in one tile
        return max(min_tb, (tb // 8) * 8), D
    # Feature dim alone blows the budget: minimal batch tile + 128-aligned D tiles.
    tb = min_tb
    td = budget // (per_elem * tb)
    td = max(128, (td // 128) * 128)
    td = min(td, _round_up(D, 128))
    return tb, td


def contrastive_loss(output1, output2, target, margin, size_average=True,
                     eps=1e-9, block_b=None, block_d=None, input_dtype=None):
    """output1, output2: (B, D) float arrays; target: (B,) {0,1} labels."""
    B, D = output1.shape
    if input_dtype is not None:       # e.g. jnp.bfloat16: halves HBM traffic
        output1 = output1.astype(input_dtype)
        output2 = output2.astype(input_dtype)
    target2d = target.reshape(B, 1).astype(jnp.float32)

    budget, vmem_limit = _vmem_budgets()
    auto_tb, auto_td = _choose_tiles(B, D, output1.dtype.itemsize, budget)
    block_b = auto_tb if block_b is None else block_b
    block_d = auto_td if block_d is None else block_d

    nb = _cdiv(B, block_b)
    nd = _cdiv(D, block_d)
    mask_rows = (B % block_b) != 0
    mask_cols = (D % block_d) != 0

    kernel = functools.partial(
        _contrastive_kernel,
        margin=float(margin), eps=float(eps),
        batch=B, block_b=block_b, feat=D, block_d=block_d,
        mask_rows=mask_rows, mask_cols=mask_cols)

    bytes_acc = (output1.size * output1.dtype.itemsize
                 + output2.size * output2.dtype.itemsize
                 + B * 4 + nb * 128 * 4)
    cost = pl.CostEstimate(flops=3 * B * D + 8 * B,
                           transcendentals=B,
                           bytes_accessed=bytes_acc)

    partials = pl.pallas_call(
        kernel,
        out_shape=jax.ShapeDtypeStruct((nb, 1, 128), jnp.float32),
        grid=(nb, nd),
        in_specs=[
            pl.BlockSpec((block_b, block_d), lambda i, d: (i, d)),
            pl.BlockSpec((block_b, block_d), lambda i, d: (i, d)),
            pl.BlockSpec((block_b, 1), lambda i, d: (i, 0)),
        ],
        out_specs=pl.BlockSpec((1, 1, 128), lambda i, d: (i, 0, 0)),
        scratch_shapes=[pltpu.VMEM((block_b, 1), jnp.float32)],
        compiler_params=pltpu.CompilerParams(
            dimension_semantics=("parallel", "arbitrary"),
            vmem_limit_bytes=vmem_limit,
        ),
        cost_estimate=cost,
    )(output1, output2, target2d)

    total = jnp.sum(partials[:, 0, 0])
    return total / jnp.float32(B) if size_average else total


def _reference(output1, output2, target, margin, size_average=True, eps=1e-9):
    d = jnp.sum((output2 - output1) ** 2, axis=-1)
    t = target.astype(jnp.float32)
    losses = (t * d
              + (1.0 - t) * jnp.maximum(margin - jnp.sqrt(d + eps), 0.0) ** 2)
    return jnp.mean(losses) if size_average else jnp.sum(losses)


if __name__ == "__main__":
    key = jax.random.PRNGKey(0)
    ks = jax.random.split(key, 12)
    margin = 1.0

    # 1) Single-tile path (B=8, D=32), mean reduction.
    o1 = jax.random.normal(ks[0], (8, 32), dtype=jnp.float32)
    o2 = jax.random.normal(ks[1], (8, 32), dtype=jnp.float32)
    tg1 = jax.random.bernoulli(ks[2], 0.5, (8,)).astype(jnp.int32)
    got = jax.block_until_ready(contrastive_loss(o1, o2, tg1, margin, True))
    ref = _reference(o1, o2, tg1, margin, True)
    assert jnp.allclose(got, ref, rtol=1e-5, atol=1e-5), (got, ref)

    # 2) Batch tiling, parallel per-tile partials + partial-last-tile masking.
    o1b = jax.random.normal(ks[3], (20, 32), dtype=jnp.float32)
    o2b = jax.random.normal(ks[4], (20, 32), dtype=jnp.float32)
    tg2 = jax.random.bernoulli(ks[5], 0.5, (20,)).astype(jnp.int32)
    got = jax.block_until_ready(
        contrastive_loss(o1b, o2b, tg2, margin, False, block_b=8))
    ref = _reference(o1b, o2b, tg2, margin, False)
    assert jnp.allclose(got, ref, rtol=1e-5, atol=1e-5), (got, ref)

    # 3) Feature-dim tiling with a partial last D tile (D=300, block_d=128).
    o1c = jax.random.normal(ks[6], (16, 300), dtype=jnp.float32)
    o2c = jax.random.normal(ks[7], (16, 300), dtype=jnp.float32)
    tg3 = jax.random.bernoulli(ks[8], 0.5, (16,)).astype(jnp.int32)
    got = jax.block_until_ready(
        contrastive_loss(o1c, o2c, tg3, margin, True, block_b=8, block_d=128))
    ref = _reference(o1c, o2c, tg3, margin, True)
    assert jnp.allclose(got, ref, rtol=1e-5, atol=1e-5), (got, ref)

    # 4) bf16-fed inputs (halves HBM bytes); kernel upcasts and accumulates f32.
    o1d = jax.random.normal(ks[9], (16, 64), dtype=jnp.float32)
    o2d = jax.random.normal(ks[10], (16, 64), dtype=jnp.float32)
    tg4 = jax.random.bernoulli(ks[11], 0.5, (16,)).astype(jnp.int32)
    got = jax.block_until_ready(
        contrastive_loss(o1d, o2d, tg4, margin, True, input_dtype=jnp.bfloat16))
    ref = _reference(o1d.astype(jnp.bfloat16).astype(jnp.float32),
                     o2d.astype(jnp.bfloat16).astype(jnp.float32),
                     tg4, margin, True)
    assert jnp.allclose(got, ref, rtol=1e-5, atol=1e-5), (got, ref)

    print("KERNEL_OK")
</pallas_src>

<mosaic_0001>
module attributes {stable_mosaic.version = 11 : i64} {
  func.func @_contrastive_kernel(%arg0: i32, %arg1: i32, %arg2: memref<8x32xf32, #tpu.memory_space<vmem>>, %arg3: memref<8x32xf32, #tpu.memory_space<vmem>>, %arg4: memref<8x1xf32, #tpu.memory_space<vmem>>, %arg5: memref<1x1x128xf32, #tpu.memory_space<vmem>>, %arg6: memref<8x1xf32, #tpu.memory_space<vmem>>) attributes {dimension_semantics = [#tpu.dimension_semantics<parallel>, #tpu.dimension_semantics<arbitrary>], iteration_bounds = array<i64: 1, 1>, scalar_prefetch = 0 : i64, scratch_operands = 1 : i64, tpu.core_type = #tpu.core_type<tc>, window_params = [{transform_indices = @transform_0, window_bounds = array<i64: 8, 32>}, {transform_indices = @transform_1, window_bounds = array<i64: 8, 32>}, {transform_indices = @transform_2, window_bounds = array<i64: 8, 1>}, {transform_indices = @transform_3, window_bounds = array<i64: 1, 1, 128>}]} {
    %c0_i32 = arith.constant 0 : i32
    %0 = arith.cmpi eq, %arg1, %c0_i32 : i32
    %1 = arith.extui %0 : i1 to i32
    %c0_i32_0 = arith.constant 0 : i32
    %2 = arith.cmpi ne, %1, %c0_i32_0 : i32
    scf.if %2 {
      %cst_10 = arith.constant 0.000000e+00 : f32
      %15 = vector.broadcast %cst_10 : f32 to vector<8x1xf32>
      %c0_11 = arith.constant 0 : index
      %c0_12 = arith.constant 0 : index
      %16 = vector.load %arg6[%c0_11, %c0_12] : memref<8x1xf32, #tpu.memory_space<vmem>>, vector<8x1xf32>
      tpu.vector_store %arg6[%c0_11, %c0_12], %15 {strides = array<i32>} : memref<8x1xf32, #tpu.memory_space<vmem>>, vector<8x1xf32>,
    } else {
    }
    %c0 = arith.constant 0 : index
    %c0_1 = arith.constant 0 : index
    %3 = vector.load %arg3[%c0, %c0_1] : memref<8x32xf32, #tpu.memory_space<vmem>>, vector<8x32xf32>
    %c0_2 = arith.constant 0 : index
    %c0_3 = arith.constant 0 : index
    %4 = vector.load %arg2[%c0_2, %c0_3] : memref<8x32xf32, #tpu.memory_space<vmem>>, vector<8x32xf32>
    %5 = arith.subf %3, %4 : vector<8x32xf32>
    %6 = arith.mulf %5, %5 : vector<8x32xf32>
    %c0_4 = arith.constant 0 : index
    %c0_5 = arith.constant 0 : index
    %7 = vector.load %arg6[%c0_4, %c0_5] : memref<8x1xf32, #tpu.memory_space<vmem>>, vector<8x1xf32>
    %cst = arith.constant dense<0.000000e+00> : vector<8xf32>
    %8 = vector.multi_reduction <add>, %6, %cst [1] : vector<8x32xf32> to vector<8xf32>
    %9 = vector.shape_cast %8 : vector<8xf32> to vector<8x1xf32>
    %10 = arith.addf %7, %9 : vector<8x1xf32>
    %c0_6 = arith.constant 0 : index
    %c0_7 = arith.constant 0 : index
    %11 = vector.load %arg6[%c0_6, %c0_7] : memref<8x1xf32, #tpu.memory_space<vmem>>, vector<8x1xf32>
    tpu.vector_store %arg6[%c0_6, %c0_7], %10 {strides = array<i32>} : memref<8x1xf32, #tpu.memory_space<vmem>>, vector<8x1xf32>,
    %c0_i32_8 = arith.constant 0 : i32
    %12 = arith.cmpi eq, %arg1, %c0_i32_8 : i32
    %13 = arith.extui %12 : i1 to i32
    %c0_i32_9 = arith.constant 0 : i32
    %14 = arith.cmpi ne, %13, %c0_i32_9 : i32
    scf.if %14 {
      %c0_10 = arith.constant 0 : index
      %c0_11 = arith.constant 0 : index
      %15 = vector.load %arg6[%c0_10, %c0_11] : memref<8x1xf32, #tpu.memory_space<vmem>>, vector<8x1xf32>
      %c0_12 = arith.constant 0 : index
      %c0_13 = arith.constant 0 : index
      %16 = vector.load %arg4[%c0_12, %c0_13] : memref<8x1xf32, #tpu.memory_space<vmem>>, vector<8x1xf32>
      %cst_14 = arith.constant 9.99999971E-10 : f32
      %17 = vector.broadcast %cst_14 : f32 to vector<8x1xf32>
      %18 = arith.addf %15, %17 : vector<8x1xf32>
      %19 = math.sqrt %18 : vector<8x1xf32>
      %cst_15 = arith.constant 1.000000e+00 : f32
      %20 = vector.broadcast %cst_15 : f32 to vector<8x1xf32>
      %21 = arith.subf %20, %19 : vector<8x1xf32>
      %cst_16 = arith.constant 0.000000e+00 : f32
      %22 = vector.broadcast %cst_16 : f32 to vector<8x1xf32>
      %23 = arith.maximumf %21, %22 : vector<8x1xf32>
      %24 = arith.mulf %16, %15 : vector<8x1xf32>
      %cst_17 = arith.constant 1.000000e+00 : f32
      %25 = vector.broadcast %cst_17 : f32 to vector<8x1xf32>
      %26 = arith.subf %25, %16 : vector<8x1xf32>
      %27 = arith.mulf %26, %23 : vector<8x1xf32>
      %28 = arith.mulf %27, %23 : vector<8x1xf32>
      %29 = arith.addf %24, %28 : vector<8x1xf32>
      %30 = vector.shape_cast %29 : vector<8x1xf32> to vector<1x8x1xf32>
      %cst_18 = arith.constant dense<0.000000e+00> : vector<1xf32>
      %31 = vector.multi_reduction <add>, %30, %cst_18 [1, 2] : vector<1x8x1xf32> to vector<1xf32>
      %32 = vector.shape_cast %31 : vector<1xf32> to vector<1x1x1xf32>
      %33 = vector.extract %32[0, 0, 0] : f32 from vector<1x1x1xf32>
      %34 = vector.broadcast %33 : f32 to vector<1x1x128xf32>
      %c0_19 = arith.constant 0 : index
      %c0_20 = arith.constant 0 : index
      %c0_21 = arith.constant 0 : index
      %35 = vector.load %arg5[%c0_19, %c0_20, %c0_21] : memref<1x1x128xf32, #tpu.memory_space<vmem>>, vector<1x1x128xf32>
      tpu.vector_store %arg5[%c0_19, %c0_20, %c0_21], %34 {strides = array<i32>} : memref<1x1x128xf32, #tpu.memory_space<vmem>>, vector<1x1x128xf32>,
    } else {
    }
    return
  }
  func.func @transform_0(%arg0: i32, %arg1: i32) -> (i32, i32) {
    %c0_i32 = arith.constant 0 : i32
    return %arg0, %arg1 : i32, i32
  }
  func.func @transform_1(%arg0: i32, %arg1: i32) -> (i32, i32) {
    %c0_i32 = arith.constant 0 : i32
    return %arg0, %arg1 : i32, i32
  }
  func.func @transform_2(%arg0: i32, %arg1: i32) -> (i32, i32) {
    %c0_i32 = arith.constant 0 : i32
    %c0_i32_0 = arith.constant 0 : i32
    return %arg0, %c0_i32 : i32, i32
  }
  func.func @transform_3(%arg0: i32, %arg1: i32) -> (i32, i32, i32) {
    %c0_i32 = arith.constant 0 : i32
    %c0_i32_0 = arith.constant 0 : i32
    %c0_i32_1 = arith.constant 0 : i32
    return %arg0, %c0_i32, %c0_i32_0 : i32, i32, i32
  }
}

</mosaic_0001>

<bundles_post_ra>
// kernel: tpu_custom_call.1
= control target key start
LH: loop header
LB: loop body
LE: loop exit
PB: predicated region body
PF: predicated region fallthrough
CT: control target
= control target key end

     0   :  { %8 = vsyncpa [#allocation4], 0  ;;  %s181_s0 = inlined_call_operand.vmem [shape: f32[8,32], index: 0, kind: input, shape index: {}]   ;;  %s182_s1 = inlined_call_operand.hbm [shape: f32[8,32], index: 1, kind: input, shape index: {}]   ;;  %s183_s2 = inlined_call_operand.vmem [shape: f32[8,1], index: 2, kind: input, shape index: {}]   ;;  %s184_s3 = inlined_call_operand.hbm [shape: f32[1,1,128], index: 3, kind: output, shape index: {}]  }
   0x1   :  { %9 = vsyncpa [#allocation5], 0  ;;  %s143_s12 = smov [#allocation3]  }
   0x2   :  { %s18_s13 = sshll.u32 %s143_s12, 4  ;;  %s19_s13 = int_to_ptr.vmem [resolvable:$true] %s18_s13 }
   0x3   :  { %s107_s14 = scalar_lea.vmem %s19_s13, 128  ;;  %p112_p1 = scmp.lt.s32.totalorder %s19_s13, %s19_s13 }
   0x4   :  { %p108_p0 = scmp.ne.s32.totalorder %s19_s13, %s107_s14  ;;  %p113_p2 = scmp.lt.s32.totalorder %s107_s14, %s107_s14 }
   0x6   :  { %p114_p3 = por %p113_p2, %p112_p1 }
   0x8   :  { %p115_p4 = pnand %p114_p3, %p108_p0 }
   0xa   :  { %118 = shalt.err (!%p115_p4)
}
   0xb   :  { %21 = dma.hbm_to_vmem [thread:$0]  %s182_s1, 128, %s19_s13, [#allocation4]  }
   0xc   :  { %139 = dma.done.wait [#allocation4], 128  }
   0xd   :  { %140 = vsyncadd [#allocation4], 4294967168  ;;  %vm31_vm0 = vcmask 7168   ;;  %v144_v0 = vmov 0.0   ;;  %v33_v1 = vld [vmem:[#allocation3] sm:$0xff]  ;;  %v34_v2 = vld [vmem:[%s181_s0] sm:$0xff] }
   0xe   :  { %32 = vst.msk [vmem:[#allocation2] sm:$0xff] %vm31_vm0, %v144_v0  ;;  %v35_v3 = vsub.f32 %v33_v1, %v34_v2  ;;  %vm38_vm1 = vcmask 261120   ;;  %v49_v15 = vld [vmem:[%s183_s2] sm:$0xff]  ;;  %s145_s2 = smov [#allocation6]  }
   0xf   :  { %v61_v18 = vsub.f32 1.0, %v49_v15  ;;  %s83_s19 = sshll.u32 %s145_s2, 4  ;;  %s84_s19 = int_to_ptr.vmem [resolvable:$true] %s83_s19 }
  0x10   :  { %v36_v4 = vmul.f32 %v35_v3, %v35_v3  ;;  %s119_s21 = scalar_lea.vmem %s84_s19, 16  ;;  %s123_s22 = scalar_lea.vmem %s84_s19, 32 }
  0x11   :  { %p120_p5 = scmp.ne.s32.totalorder %s84_s19, %s119_s21  ;;  %p124_p6 = scmp.lt.s32.totalorder %s84_s19, %s84_s19 }
  0x12   :  { %v39_v5 = vsel %vm38_vm1, %v36_v4, 0.0  ;;  %p125_p7 = scmp.lt.s32.totalorder %s123_s22, %s119_s21 }
  0x13   :  { %40 = vadd.xlane.f32.xlu0 %v39_v5 }
  0x14   :  { %p126_p8 = por %p125_p7, %p124_p6 }
  0x15   :  { %v37_v6 = vld [vmem:[#allocation2] sm:$0xff] }
  0x16   :  { %p127_p9 = pnand %p126_p8, %p120_p5 }
  0x9c   :  { %v41_v7 = vpop.xlane.xlu0 %40 }
  0x9d   :  { %v42_v8 = vadd.f32 %v41_v7, %v37_v6 }
  0x9f   :  { %44 = vst.msk [vmem:[#allocation2] sm:$0xff] %vm31_vm0, %v42_v8 }
  0xa6   :  { %v48_v9 = vld [vmem:[#allocation2] sm:$0xff] }
  0xa7   :  { %v50_v10 = vadd.f32 1e-09, %v48_v9  ;;  %v60_v21 = vmul.f32 %v49_v15, %v48_v9 }
  0xa9   :  { %97 = vrsqrt.f32 %v50_v10  ;;  %vm53_vm2 = vcmp.eq.f32.partialorder %v50_v10, inf  ;;  %v56_v13 = vand.u32 2147483648, %v50_v10  ;;  %vm55_vm3 = vcmp.eq.f32.partialorder %v50_v10, 0.0 }
  0xb6   :  { %v98_v11 = vpop.eup %97 }
  0xb7   :  { %v52_v12 = vmul.f32 %v98_v11, %v50_v10 }
  0xb9   :  { %v54_v14 = vsel %vm53_vm2, %v50_v10, %v52_v12 }
  0xba   :  { %v57_v16 = vsel %vm55_vm3, %v56_v13, %v54_v14 }
  0xbb   :  { %v58_v17 = vsub.f32 1.0, %v57_v16 }
  0xbd   :  { %v59_v19 = vmax.f32 %v58_v17, 0.0 }
  0xbf   :  { %v62_v20 = vmul.f32 %v61_v18, %v59_v19 }
  0xc1   :  { %v63_v22 = vmul.f32 %v62_v20, %v59_v19 }
  0xc3   :  { %v64_v23 = vadd.f32 %v63_v22, %v60_v21 }
  0xc5   :  { %v65_v24 = vsel %vm31_vm0, %v64_v23, 0.0 }
  0xc6   :  { %66 = vadd.xlane.f32.xlu0 %v65_v24 }
 0x14f   :  { %v67_v25 = vpop.xlane.xlu0 %66 }
 0x150   :  { %v68_v26 = vrot.slane %v67_v25, 4 }
 0x152   :  { %v69_v27 = vadd.f32 %v68_v26, %v67_v25 }
 0x154   :  { %v70_v28 = vrot.slane %v69_v27, 2 }
 0x156   :  { %v71_v29 = vadd.f32 %v70_v28, %v69_v27 }
 0x158   :  { %v72_v30 = vrot.slane %v71_v29, 1 }
 0x15a   :  { %v73_v31 = vadd.f32 %v72_v30, %v71_v29 }
 0x15c   :  { %92 = vpush %v73_v31 }
 0x18d   :  { %s93_s20 = spop %92 }
 0x18e   :  { %v75_v32 = vstv %s93_s20 }
 0x18f   :  { %76 = vst [vmem:[#allocation6] sm:$0x1] %v75_v32 }
 0x190   :  { %130 = shalt.err (!%p127_p9)
}
 0x191   :  { %86 = dma.vmem_to_hbm [thread:$0]  %s84_s19, 16, %s184_s3, [#allocation5]  }
 0x192   :  { %141 = dma.done.wait [#allocation5], 16  }
 0x193   :  { %142 = vsyncadd [#allocation5], 4294967280 }
 0x194   :  { %90 = vsyncpa [#allocation4], 1 }
 0x195   :  { %91 = vsyncpa [#allocation5], 1 }

</bundles_post_ra>
